<compile_context>
chip_gen: v6e
topology: v6e:2x2x1
jax: 0.10.0
libtpu: 0.0.40
codegen_flags: <defaults>
</compile_context>

<pallas_src>
import functools
import math

import jax
import jax.numpy as jnp
from jax.experimental import pallas as pl
from jax.experimental.pallas import tpu as pltpu

# -log(clip(one_hot, 1e-4, 1.0)) off the label column.
_NEG_LOG_1E4 = -math.log(1e-4)


def nce_rce_kernel(pred_ref, labels_ref, weight_ref, class_id_ref, out_ref,
                   nce_acc_ref, rce_acc_ref, *,
                   alpha, beta, n_total, tile_n, tiles_per_shard):
    s_idx = pl.program_id(0)   # parallel shard (maps to a TensorCore on v7x)
    j_idx = pl.program_id(1)   # sequential tile within the shard

    @pl.when(j_idx == 0)
    def _init():
        nce_acc_ref[...] = jnp.zeros_like(nce_acc_ref)
        rce_acc_ref[...] = jnp.zeros_like(rce_acc_ref)

    pred = pred_ref[...].astype(jnp.float32)        # (C, T): classes x batch
    labels = labels_ref[...]                        # (1, T) int32
    w_cls = weight_ref[...]                         # (C, 1) f32
    cls_id = class_id_ref[...]                      # (C, 1) int32
    _, t = pred.shape

    # --- shared softmax / log-softmax over the class (sublane) axis ----------
    m = jnp.max(pred, axis=0, keepdims=True)        # (1, T)
    shifted = pred - m
    e = jnp.exp(shifted)
    ssum = jnp.sum(e, axis=0, keepdims=True)        # (1, T)
    log_sm = shifted - jnp.log(ssum)                # log_softmax
    sm = jnp.maximum(e * (1.0 / ssum), 1e-7)        # clamp(min=1e-7); max=1 no-op

    # --- label selection without a float one-hot -----------------------------
    sel = cls_id == labels                          # (C, T) bool (broadcast)

    # merged class reductions (cheap sublane reduces)
    w_i = jnp.sum(jnp.where(sel, w_cls, 0.0), axis=0, keepdims=True)            # weight[y]
    wlogp = jnp.sum(jnp.where(sel, w_cls * log_sm, 0.0), axis=0, keepdims=True)  # w[y]*log_sm[y]
    sum_logsm = jnp.sum(log_sm, axis=0, keepdims=True)
    off_sm = jnp.sum(jnp.where(sel, 0.0, sm), axis=0, keepdims=True)             # sum_{c!=y} sm

    # NCE_i = (w[y] * log_sm[y]) / sum_c log_sm
    nce = wlogp / sum_logsm                         # (1, T)
    # RCE_i = -sum_c w[y] * sm_c * log(clip(onehot,1e-4,1)) = -log(1e-4)*w[y]*off_sm
    rce = _NEG_LOG_1E4 * w_i * off_sm               # (1, T)

    # mask padded tail rows
    global_tile = s_idx * tiles_per_shard + j_idx
    col = jax.lax.broadcasted_iota(jnp.int32, (1, t), 1) + global_tile * tile_n
    valid = (col < n_total).astype(jnp.float32)     # (1, T)

    nce_acc_ref[...] += nce * valid
    rce_acc_ref[...] += rce * valid

    @pl.when(j_idx == pl.num_programs(1) - 1)
    def _finalize():
        partial = (alpha * jnp.sum(nce_acc_ref[...])
                   + beta * jnp.sum(rce_acc_ref[...]))
        out_ref[...] = jnp.broadcast_to(partial, out_ref.shape)


def _round_up(x, m):
    return ((x + m - 1) // m) * m


def _vmem_plan():
    """Return (tile VMEM budget, scoped vmem limit) in bytes, generation-aware."""
    cap = 64 * 1024 * 1024  # conservative default = v7x per-TC VMEM
    try:
        info = pltpu.get_tpu_info()
        cap = int(getattr(info, "vmem_capacity_bytes", cap) or cap)
    except Exception:
        pass
    if cap >= 96 * 1024 * 1024:                      # v5e / v6e: 128 MiB per core
        return 48 * 1024 * 1024, 80 * 1024 * 1024
    return 28 * 1024 * 1024, 44 * 1024 * 1024        # v7x: 64 MiB per core


def nce_and_rce(pred, labels, weight, *, num_classes, alpha=1.0, beta=1.0,
                max_tile_n=8192):
    """pred: (N, C) float (any dtype), labels: (N,) int, weight: (C,) -> scalar loss."""
    n, c = pred.shape
    assert c == num_classes
    assert num_classes >= 2, "NCE denominator is 0 when num_classes == 1"

    vmem_budget, vmem_limit = _vmem_plan()
    itemsize = jnp.dtype(pred.dtype).itemsize

    # Per-batch-element VMEM estimate: 2 double-buffered input columns of C
    # entries + ~6 f32 (C,) compiler temporaries + labels/accumulator columns.
    bytes_per_col = c * (2 * itemsize + 6 * 4) + 24
    tile_budget = max(128, (vmem_budget // bytes_per_col) // 128 * 128)
    tile_n = max(128, min(max(128, int(max_tile_n) // 128 * 128),
                          tile_budget, _round_up(n, 128)))

    total_tiles = -(-n // tile_n)
    num_shards = 2 if total_tiles >= 2 else 1        # lets v7x use both TCs
    tiles_per_shard = -(-total_tiles // num_shards)
    n_pad = num_shards * tiles_per_shard * tile_n

    # Batch-on-lanes layout: classes on sublanes, batch on lanes.
    pred_t = jnp.transpose(pred)                     # (C, N), native dtype
    labels_i = labels.astype(jnp.int32)
    if n_pad != n:
        pred_t = jnp.pad(pred_t, ((0, 0), (0, n_pad - n)))
        labels_i = jnp.pad(labels_i, (0, n_pad - n))
    labels_2d = labels_i.reshape(1, n_pad)
    weight_2d = weight.astype(jnp.float32).reshape(c, 1)
    class_ids = jnp.arange(c, dtype=jnp.int32).reshape(c, 1)

    kernel = functools.partial(
        nce_rce_kernel, alpha=float(alpha), beta=float(beta),
        n_total=n, tile_n=tile_n, tiles_per_shard=tiles_per_shard)

    cost = pl.CostEstimate(
        flops=15 * n * c,
        transcendentals=n * c + 2 * n,
        bytes_accessed=n * c * itemsize + n * 4 + num_shards * 8 * 128 * 4)

    out = pl.pallas_call(
        kernel,
        out_shape=jax.ShapeDtypeStruct((num_shards, 8, 128), jnp.float32),
        grid_spec=pltpu.PrefetchScalarGridSpec(
            num_scalar_prefetch=0,
            grid=(num_shards, tiles_per_shard),
            in_specs=[
                pl.BlockSpec((c, tile_n),                       # pred (native dtype DMA)
                             lambda s, j, tps=tiles_per_shard: (0, s * tps + j)),
                pl.BlockSpec((1, tile_n),                       # labels
                             lambda s, j, tps=tiles_per_shard: (0, s * tps + j)),
                pl.BlockSpec((c, 1), lambda s, j: (0, 0)),      # class weights, resident
                pl.BlockSpec((c, 1), lambda s, j: (0, 0)),      # class ids, resident
            ],
            out_specs=pl.BlockSpec((1, 8, 128), lambda s, j: (s, 0, 0)),
            scratch_shapes=[pltpu.VMEM((1, tile_n), jnp.float32),   # nce partials
                            pltpu.VMEM((1, tile_n), jnp.float32)],  # rce partials
        ),
        compiler_params=pltpu.CompilerParams(
            dimension_semantics=("parallel", "arbitrary"),
            vmem_limit_bytes=vmem_limit),
        cost_estimate=cost,
    )(pred_t, labels_2d, weight_2d, class_ids)

    # Per-shard partials already include alpha/beta; mean over the true N.
    return jnp.sum(out[:, 0, 0]) / n


def _reference(pred, labels, weight, num_classes, alpha, beta):
    pred_f = pred.astype(jnp.float32)
    log_sm = jax.nn.log_softmax(pred_f, axis=1)
    oh = jax.nn.one_hot(labels, num_classes, dtype=jnp.float32)
    w = weight.astype(jnp.float32)[labels]
    nce = -jnp.sum(w[:, None] * oh * log_sm, axis=1) / (-jnp.sum(log_sm, axis=1))
    sm = jnp.clip(jax.nn.softmax(pred_f, axis=1), 1e-7, 1.0)
    rce = -jnp.sum(w[:, None] * sm * jnp.log(jnp.clip(oh, 1e-4, 1.0)), axis=1)
    return alpha * jnp.mean(nce) + beta * jnp.mean(rce)


if __name__ == "__main__":
    num_classes = 10
    alpha, beta = 1.0, 1.0

    key = jax.random.PRNGKey(0)
    k_pred, k_lab, k_pred2, k_lab2 = jax.random.split(key, 4)
    # deterministic synthetic class weights (stand-in for the module's `weight`)
    weight = jnp.linspace(0.5, 1.5, num_classes, dtype=jnp.float32)

    # Case 1: tiny batch -> single tile, single shard.
    pred = jax.random.normal(k_pred, (8, num_classes), dtype=jnp.float32)
    labels = jax.random.randint(k_lab, (8,), 0, num_classes, dtype=jnp.int32)
    loss = jax.block_until_ready(
        nce_and_rce(pred, labels, weight, num_classes=num_classes,
                    alpha=alpha, beta=beta))
    ref = _reference(pred, labels, weight, num_classes, alpha, beta)
    assert jnp.allclose(loss, ref, rtol=1e-5, atol=1e-5), (loss, ref)

    # Case 2: multi-tile grid, 2 parallel shards, padded tail (forces tile_n=128).
    pred2 = jax.random.normal(k_pred2, (300, num_classes), dtype=jnp.float32)
    labels2 = jax.random.randint(k_lab2, (300,), 0, num_classes, dtype=jnp.int32)
    loss2 = jax.block_until_ready(
        nce_and_rce(pred2, labels2, weight, num_classes=num_classes,
                    alpha=alpha, beta=beta, max_tile_n=128))
    ref2 = _reference(pred2, labels2, weight, num_classes, alpha, beta)
    assert jnp.allclose(loss2, ref2, rtol=1e-5, atol=1e-5), (loss2, ref2)

    print("KERNEL_OK")
</pallas_src>

<mosaic_0001>
module attributes {stable_mosaic.version = 11 : i64} {
  func.func @nce_rce_kernel(%arg0: i32, %arg1: i32, %arg2: memref<10x128xf32, #tpu.memory_space<vmem>>, %arg3: memref<1x128xi32, #tpu.memory_space<vmem>>, %arg4: memref<10x1xf32, #tpu.memory_space<vmem>>, %arg5: memref<10x1xi32, #tpu.memory_space<vmem>>, %arg6: memref<1x8x128xf32, #tpu.memory_space<vmem>>, %arg7: memref<1x128xf32, #tpu.memory_space<vmem>>, %arg8: memref<1x128xf32, #tpu.memory_space<vmem>>) attributes {dimension_semantics = [#tpu.dimension_semantics<parallel>, #tpu.dimension_semantics<arbitrary>], iteration_bounds = array<i64: 1, 1>, scalar_prefetch = 0 : i64, scratch_operands = 2 : i64, tpu.core_type = #tpu.core_type<tc>, window_params = [{transform_indices = @transform_0, window_bounds = array<i64: 10, 128>}, {transform_indices = @transform_1, window_bounds = array<i64: 1, 128>}, {pipeline_mode = #tpu.pipeline_mode<synchronous>, transform_indices = @transform_2, window_bounds = array<i64: 10, 1>}, {pipeline_mode = #tpu.pipeline_mode<synchronous>, transform_indices = @transform_3, window_bounds = array<i64: 10, 1>}, {transform_indices = @transform_4, window_bounds = array<i64: 1, 8, 128>}]} {
    %c0_i32 = arith.constant 0 : i32
    %0 = arith.cmpi eq, %arg1, %c0_i32 : i32
    %1 = arith.extui %0 : i1 to i32
    %c0_i32_0 = arith.constant 0 : i32
    %2 = arith.cmpi ne, %1, %c0_i32_0 : i32
    scf.if %2 {
      %cst_29 = arith.constant 0.000000e+00 : f32
      %69 = vector.broadcast %cst_29 : f32 to vector<1x128xf32>
      %c0_30 = arith.constant 0 : index
      %c0_31 = arith.constant 0 : index
      %70 = vector.load %arg7[%c0_30, %c0_31] : memref<1x128xf32, #tpu.memory_space<vmem>>, vector<1x128xf32>
      tpu.vector_store %arg7[%c0_30, %c0_31], %69 {strides = array<i32>} : memref<1x128xf32, #tpu.memory_space<vmem>>, vector<1x128xf32>,
      %cst_32 = arith.constant 0.000000e+00 : f32
      %71 = vector.broadcast %cst_32 : f32 to vector<1x128xf32>
      %c0_33 = arith.constant 0 : index
      %c0_34 = arith.constant 0 : index
      %72 = vector.load %arg8[%c0_33, %c0_34] : memref<1x128xf32, #tpu.memory_space<vmem>>, vector<1x128xf32>
      tpu.vector_store %arg8[%c0_33, %c0_34], %71 {strides = array<i32>} : memref<1x128xf32, #tpu.memory_space<vmem>>, vector<1x128xf32>,
    } else {
    }
    %c0 = arith.constant 0 : index
    %c0_1 = arith.constant 0 : index
    %3 = vector.load %arg2[%c0, %c0_1] : memref<10x128xf32, #tpu.memory_space<vmem>>, vector<10x128xf32>
    %c0_2 = arith.constant 0 : index
    %c0_3 = arith.constant 0 : index
    %4 = vector.load %arg3[%c0_2, %c0_3] : memref<1x128xi32, #tpu.memory_space<vmem>>, vector<1x128xi32>
    %c0_4 = arith.constant 0 : index
    %c0_5 = arith.constant 0 : index
    %5 = vector.load %arg4[%c0_4, %c0_5] : memref<10x1xf32, #tpu.memory_space<vmem>>, vector<10x1xf32>
    %c0_6 = arith.constant 0 : index
    %c0_7 = arith.constant 0 : index
    %6 = vector.load %arg5[%c0_6, %c0_7] : memref<10x1xi32, #tpu.memory_space<vmem>>, vector<10x1xi32>
    %cst = arith.constant dense<0xFF800000> : vector<128xf32>
    %7 = vector.multi_reduction <maximumf>, %3, %cst [0] : vector<10x128xf32> to vector<128xf32>
    %8 = vector.shape_cast %7 : vector<128xf32> to vector<1x128xf32>
    %9 = vector.broadcast %8 : vector<1x128xf32> to vector<10x128xf32>
    %10 = arith.subf %3, %9 : vector<10x128xf32>
    %11 = math.exp %10 : vector<10x128xf32>
    %cst_8 = arith.constant dense<0.000000e+00> : vector<128xf32>
    %12 = vector.multi_reduction <add>, %11, %cst_8 [0] : vector<10x128xf32> to vector<128xf32>
    %13 = vector.shape_cast %12 : vector<128xf32> to vector<1x128xf32>
    %14 = math.log %13 : vector<1x128xf32>
    %15 = vector.broadcast %14 : vector<1x128xf32> to vector<10x128xf32>
    %16 = arith.subf %10, %15 : vector<10x128xf32>
    %cst_9 = arith.constant 1.000000e+00 : f32
    %17 = vector.broadcast %cst_9 : f32 to vector<1x128xf32>
    %18 = arith.divf %17, %13 : vector<1x128xf32>
    %19 = vector.broadcast %18 : vector<1x128xf32> to vector<10x128xf32>
    %20 = arith.mulf %11, %19 : vector<10x128xf32>
    %cst_10 = arith.constant 1.000000e-07 : f32
    %21 = vector.broadcast %cst_10 : f32 to vector<10x128xf32>
    %22 = arith.maximumf %20, %21 : vector<10x128xf32>
    %23 = vector.broadcast %6 : vector<10x1xi32> to vector<10x128xi32>
    %24 = vector.broadcast %4 : vector<1x128xi32> to vector<10x128xi32>
    %25 = arith.cmpi eq, %23, %24 : vector<10x128xi32>
    %cst_11 = arith.constant 0.000000e+00 : f32
    %26 = vector.shape_cast %5 : vector<10x1xf32> to vector<10x1xf32>
    %27 = vector.broadcast %26 : vector<10x1xf32> to vector<10x128xf32>
    %28 = vector.broadcast %cst_11 : f32 to vector<10x128xf32>
    %29 = arith.select %25, %27, %28 : vector<10x128xi1>, vector<10x128xf32>
    %cst_12 = arith.constant dense<0.000000e+00> : vector<128xf32>
    %30 = vector.multi_reduction <add>, %29, %cst_12 [0] : vector<10x128xf32> to vector<128xf32>
    %31 = vector.shape_cast %30 : vector<128xf32> to vector<1x128xf32>
    %32 = vector.broadcast %5 : vector<10x1xf32> to vector<10x128xf32>
    %33 = arith.mulf %32, %16 : vector<10x128xf32>
    %cst_13 = arith.constant 0.000000e+00 : f32
    %34 = vector.broadcast %cst_13 : f32 to vector<10x128xf32>
    %35 = arith.select %25, %33, %34 : vector<10x128xi1>, vector<10x128xf32>
    %cst_14 = arith.constant dense<0.000000e+00> : vector<128xf32>
    %36 = vector.multi_reduction <add>, %35, %cst_14 [0] : vector<10x128xf32> to vector<128xf32>
    %37 = vector.shape_cast %36 : vector<128xf32> to vector<1x128xf32>
    %cst_15 = arith.constant dense<0.000000e+00> : vector<128xf32>
    %38 = vector.multi_reduction <add>, %16, %cst_15 [0] : vector<10x128xf32> to vector<128xf32>
    %39 = vector.shape_cast %38 : vector<128xf32> to vector<1x128xf32>
    %cst_16 = arith.constant 0.000000e+00 : f32
    %40 = vector.broadcast %cst_16 : f32 to vector<10x128xf32>
    %41 = arith.select %25, %40, %22 : vector<10x128xi1>, vector<10x128xf32>
    %cst_17 = arith.constant dense<0.000000e+00> : vector<128xf32>
    %42 = vector.multi_reduction <add>, %41, %cst_17 [0] : vector<10x128xf32> to vector<128xf32>
    %43 = vector.shape_cast %42 : vector<128xf32> to vector<1x128xf32>
    %44 = arith.divf %37, %39 : vector<1x128xf32>
    %cst_18 = arith.constant 9.21034049 : f32
    %45 = vector.broadcast %cst_18 : f32 to vector<1x128xf32>
    %46 = arith.mulf %45, %31 : vector<1x128xf32>
    %47 = arith.mulf %46, %43 : vector<1x128xf32>
    %c1_i32 = arith.constant 1 : i32
    %48 = arith.muli %arg0, %c1_i32 : i32
    %49 = arith.addi %48, %arg1 : i32
    %50 = tpu.iota {dimensions = array<i32: 1>} : vector<1x128xi32>
    %c128_i32 = arith.constant 128 : i32
    %51 = arith.muli %49, %c128_i32 : i32
    %52 = vector.broadcast %51 : i32 to vector<1x128xi32>
    %53 = arith.addi %50, %52 : vector<1x128xi32>
    %c8_i32 = arith.constant 8 : i32
    %54 = vector.broadcast %c8_i32 : i32 to vector<1x128xi32>
    %55 = arith.cmpi slt, %53, %54 : vector<1x128xi32>
    %56 = arith.extui %55 : vector<1x128xi1> to vector<1x128xi32>
    %57 = arith.sitofp %56 : vector<1x128xi32> to vector<1x128xf32>
    %c0_19 = arith.constant 0 : index
    %c0_20 = arith.constant 0 : index
    %58 = vector.load %arg7[%c0_19, %c0_20] : memref<1x128xf32, #tpu.memory_space<vmem>>, vector<1x128xf32>
    %59 = arith.mulf %44, %57 : vector<1x128xf32>
    %60 = arith.addf %58, %59 : vector<1x128xf32>
    %c0_21 = arith.constant 0 : index
    %c0_22 = arith.constant 0 : index
    %61 = vector.load %arg7[%c0_21, %c0_22] : memref<1x128xf32, #tpu.memory_space<vmem>>, vector<1x128xf32>
    tpu.vector_store %arg7[%c0_21, %c0_22], %60 {strides = array<i32>} : memref<1x128xf32, #tpu.memory_space<vmem>>, vector<1x128xf32>,
    %c0_23 = arith.constant 0 : index
    %c0_24 = arith.constant 0 : index
    %62 = vector.load %arg8[%c0_23, %c0_24] : memref<1x128xf32, #tpu.memory_space<vmem>>, vector<1x128xf32>
    %63 = arith.mulf %47, %57 : vector<1x128xf32>
    %64 = arith.addf %62, %63 : vector<1x128xf32>
    %c0_25 = arith.constant 0 : index
    %c0_26 = arith.constant 0 : index
    %65 = vector.load %arg8[%c0_25, %c0_26] : memref<1x128xf32, #tpu.memory_space<vmem>>, vector<1x128xf32>
    tpu.vector_store %arg8[%c0_25, %c0_26], %64 {strides = array<i32>} : memref<1x128xf32, #tpu.memory_space<vmem>>, vector<1x128xf32>,
    %c0_i32_27 = arith.constant 0 : i32
    %66 = arith.cmpi eq, %arg1, %c0_i32_27 : i32
    %67 = arith.extui %66 : i1 to i32
    %c0_i32_28 = arith.constant 0 : i32
    %68 = arith.cmpi ne, %67, %c0_i32_28 : i32
    scf.if %68 {
      %c0_29 = arith.constant 0 : index
      %c0_30 = arith.constant 0 : index
      %69 = vector.load %arg7[%c0_29, %c0_30] : memref<1x128xf32, #tpu.memory_space<vmem>>, vector<1x128xf32>
      %70 = vector.shape_cast %69 : vector<1x128xf32> to vector<1x1x128xf32>
      %cst_31 = arith.constant dense<0.000000e+00> : vector<1xf32>
      %71 = vector.multi_reduction <add>, %70, %cst_31 [1, 2] : vector<1x1x128xf32> to vector<1xf32>
      %72 = vector.shape_cast %71 : vector<1xf32> to vector<1x1x1xf32>
      %73 = vector.extract %72[0, 0, 0] : f32 from vector<1x1x1xf32>
      %cst_32 = arith.constant 1.000000e+00 : f32
      %74 = arith.mulf %cst_32, %73 : f32
      %c0_33 = arith.constant 0 : index
      %c0_34 = arith.constant 0 : index
      %75 = vector.load %arg8[%c0_33, %c0_34] : memref<1x128xf32, #tpu.memory_space<vmem>>, vector<1x128xf32>
      %76 = vector.shape_cast %75 : vector<1x128xf32> to vector<1x1x128xf32>
      %cst_35 = arith.constant dense<0.000000e+00> : vector<1xf32>
      %77 = vector.multi_reduction <add>, %76, %cst_35 [1, 2] : vector<1x1x128xf32> to vector<1xf32>
      %78 = vector.shape_cast %77 : vector<1xf32> to vector<1x1x1xf32>
      %79 = vector.extract %78[0, 0, 0] : f32 from vector<1x1x1xf32>
      %cst_36 = arith.constant 1.000000e+00 : f32
      %80 = arith.mulf %cst_36, %79 : f32
      %81 = arith.addf %74, %80 : f32
      %82 = vector.broadcast %81 : f32 to vector<1x8x128xf32>
      %c0_37 = arith.constant 0 : index
      %c0_38 = arith.constant 0 : index
      %c0_39 = arith.constant 0 : index
      %83 = vector.load %arg6[%c0_37, %c0_38, %c0_39] : memref<1x8x128xf32, #tpu.memory_space<vmem>>, vector<1x8x128xf32>
      tpu.vector_store %arg6[%c0_37, %c0_38, %c0_39], %82 {strides = array<i32>} : memref<1x8x128xf32, #tpu.memory_space<vmem>>, vector<1x8x128xf32>,
    } else {
    }
    return
  }
  func.func @transform_0(%arg0: i32, %arg1: i32) -> (i32, i32) {
    %c1_i32 = arith.constant 1 : i32
    %0 = arith.muli %arg0, %c1_i32 : i32
    %1 = arith.addi %0, %arg1 : i32
    %c0_i32 = arith.constant 0 : i32
    %c0_i32_0 = arith.constant 0 : i32
    return %c0_i32, %1 : i32, i32
  }
  func.func @transform_1(%arg0: i32, %arg1: i32) -> (i32, i32) {
    %c1_i32 = arith.constant 1 : i32
    %0 = arith.muli %arg0, %c1_i32 : i32
    %1 = arith.addi %0, %arg1 : i32
    %c0_i32 = arith.constant 0 : i32
    %c0_i32_0 = arith.constant 0 : i32
    return %c0_i32, %1 : i32, i32
  }
  func.func @transform_2(%arg0: i32, %arg1: i32) -> (i32, i32) {
    %c0_i32 = arith.constant 0 : i32
    %c0_i32_0 = arith.constant 0 : i32
    %c0_i32_1 = arith.constant 0 : i32
    return %c0_i32, %c0_i32_0 : i32, i32
  }
  func.func @transform_3(%arg0: i32, %arg1: i32) -> (i32, i32) {
    %c0_i32 = arith.constant 0 : i32
    %c0_i32_0 = arith.constant 0 : i32
    %c0_i32_1 = arith.constant 0 : i32
    return %c0_i32, %c0_i32_0 : i32, i32
  }
  func.func @transform_4(%arg0: i32, %arg1: i32) -> (i32, i32, i32) {
    %c0_i32 = arith.constant 0 : i32
    %c0_i32_0 = arith.constant 0 : i32
    %c0_i32_1 = arith.constant 0 : i32
    return %arg0, %c0_i32, %c0_i32_0 : i32, i32, i32
  }
}

</mosaic_0001>

<bundles_post_ra>
// kernel: tpu_custom_call.1
= control target key start
LH: loop header
LB: loop body
LE: loop exit
PB: predicated region body
PF: predicated region fallthrough
CT: control target
= control target key end

     0   :  { %v273_v2 = vmov 0   ;;  %vm62_vm0 = vcmask 1041408   ;;  %s334_s0 = inlined_call_operand.vmem [shape: f32[10,128], index: 0, kind: input, shape index: {}]   ;;  %s335_s1 = inlined_call_operand.vmem [shape: s32[1,128], index: 1, kind: input, shape index: {}]   ;;  %s336_s2 = inlined_call_operand.vmem [shape: f32[10,1], index: 2, kind: input, shape index: {}]   ;;  %s337_s3 = inlined_call_operand.vmem [shape: s32[10,1], index: 3, kind: input, shape index: {}]   ;;  %s338_s4 = inlined_call_operand.hbm [shape: f32[1,8,128], index: 4, kind: output, shape index: {}]  }
   0x1   :  { %v61_v0 = vld [vmem:[%s337_s3 + $0x8] sm:$0x3]  ;;  %240 = vset.pattern.permute.xlu1 %v273_v2  ;;  %239 = vset.pattern.permute.xlu0 %v273_v2  ;;  %v55_v3 = vld [vmem:[%s334_s0] sm:$0xff] }
   0x2   :  { %v59_v1 = vld [vmem:[%s336_s2 + $0x8] sm:$0x3]  ;;  %99 = vperm.xlu0 %239, %v61_v0  }
   0x3   :  { %v56_v4 = vld [vmem:[%s334_s0 + $0x8] sm:$0x3]  ;;  %114 = vperm.xlu1 %240, %v59_v1  }
   0x4   :  { %v63_v5 = vsel %vm62_vm0, %v56_v4, -inf }
   0x5   :  { %9 = vsyncpa [#allocation5], 0  ;;  %v60_v6 = vld [vmem:[%s337_s3] sm:$0xff]  ;;  %v64_v8 = vmax.f32 %v55_v3, %v63_v5  ;;  %v274_v14 = vmov 0.0   ;;  %vm182_vm4 = vcmask 1040384   ;;  %s275_s3 = smov [#allocation4]  }
   0x6   :  { %v58_v7 = vld [vmem:[%s336_s2] sm:$0xff]  ;;  %96 = vperm.xlu0 %239, %v60_v6   ;;  %53 = vst [vmem:[#allocation2] sm:$0x1] %v274_v14  ;;  %54 = vst [vmem:[#allocation3] sm:$0x1] %v274_v14  ;;  %s213_s27 = sshll.u32 %s275_s3, 4  ;;  %s214_s27 = int_to_ptr.vmem [resolvable:$true] %s213_s27 }
   0x7   :  { %v65_v9 = vrot.slane %v64_v8, 4  ;;  %109 = vperm.xlu1 %240, %v58_v7   ;;  %v230_v43 = vld [vmem:[%s335_s1] ss:$0 sm:$0xff]  ;;  %s251_s30 = scalar_lea.vmem %s214_s27, 128  ;;  %p256_p1 = scmp.lt.s32.totalorder %s214_s27, %s214_s27 }
   0x8   :  { %p252_p0 = scmp.ne.s32.totalorder %s214_s27, %s251_s30  ;;  %p257_p2 = scmp.lt.s32.totalorder %s251_s30, %s251_s30 }
   0x9   :  { %v66_v10 = vmax.f32 %v64_v8, %v65_v9 }
   0xa   :  { %p258_p3 = por %p257_p2, %p256_p1 }
   0xb   :  { %v67_v11 = vrot.slane %v66_v10, 2 }
   0xc   :  { %p259_p4 = pnand %p258_p3, %p252_p0 }
   0xd   :  { %v68_v12 = vmax.f32 %v66_v10, %v67_v11 }
   0xf   :  { %v69_v13 = vrot.slane %v68_v12, 1 }
  0x11   :  { %v70_v15 = vmax.f32 %v68_v12, %v69_v13 }
  0x13   :  { %v72_v16 = vsub.f32 %v56_v4, %v70_v15  ;;  %v71_v17 = vsub.f32 %v55_v3, %v70_v15  ;;  %v162_v4 = vlaneseq }
  0x15   :  { %v75_v18 = vmul.f32 1.442695, %v72_v16  ;;  %v73_v19 = vmul.f32 1.442695, %v71_v17  ;;  %v163_v11 = vand.u32 127, %v162_v4 }
  0x17   :  { %241 = vpow2.f32 %v75_v18  ;;  %vm167_vm3 = vcmp.lt.s32.totalorder %v163_v11, 8 }
  0x18   :  { %243 = vpow2.f32 %v73_v19 }
  0x24   :  { %v242_v20 = vpop.eup %241 }
  0x25   :  { %v244_v21 = vpop.eup %243  ;;  %v77_v22 = vsel %vm62_vm0, %v242_v20, 0.0 }
  0x26   :  { %v78_v23 = vadd.f32 %v244_v21, %v77_v22 }
  0x28   :  { %v79_v24 = vrot.slane %v78_v23, 4 }
  0x2a   :  { %v80_v25 = vadd.f32 %v79_v24, %v78_v23 }
  0x2c   :  { %v81_v26 = vrot.slane %v80_v25, 2 }
  0x2e   :  { %v82_v27 = vadd.f32 %v81_v26, %v80_v25  ;;  %v231_v25 = vsel %vm167_vm3, 1.0, %v274_v14 }
  0x30   :  { %v83_v28 = vrot.slane %v82_v27, 1 }
  0x32   :  { %v84_v29 = vadd.f32 %v83_v28, %v82_v27  ;;  %v170_v28 = vld [vmem:[#allocation2] sm:$0x1] }
  0x34   :  { %245 = vlog2.f32 %v84_v29 }
  0x35   :  { %247 = vrcp.f32 %v84_v29 }
  0x41   :  { %v246_v30 = vpop.eup %245 }
  0x42   :  { %v86_v31 = vmul.f32 0.6931472, %v246_v30  ;;  %v248_v39 = vpop.eup %247  ;;  %v174_v30 = vld [vmem:[#allocation3] sm:$0x1] }
  0x43   :  { %v92_v41 = vmul.f32 %v248_v39, %v242_v20  ;;  %v91_v44 = vmul.f32 %v248_v39, %v244_v21 }
  0x44   :  { %v88_v32 = vsub.f32 %v72_v16, %v86_v31  ;;  %v87_v33 = vsub.f32 %v71_v17, %v86_v31 }
  0x45   :  { %v94_v45 = vmax.f32 %v92_v41, 1e-07  ;;  %v93_v50 = vmax.f32 %v91_v44, 1e-07 }
  0x46   :  { %v139_v34 = vsel %vm62_vm0, %v88_v32, 0.0 }
  0x47   :  { %v140_v35 = vadd.f32 %v139_v34, %v87_v33 }
  0x49   :  { %v141_v36 = vrot.slane %v140_v35, 4 }
  0x4b   :  { %v142_v37 = vadd.f32 %v141_v36, %v140_v35 }
  0x4d   :  { %v143_v38 = vrot.slane %v142_v37, 2 }
  0x4f   :  { %v144_v40 = vadd.f32 %v143_v38, %v142_v37 }
  0x51   :  { %v145_v42 = vrot.slane %v144_v40, 1 }
  0x53   :  { %v146_v49 = vadd.f32 %v145_v42, %v144_v40 }
  0x55   :  { %249 = vrcp.f32 %v146_v49 }
  0x62   :  { %v250_v19 = vpop.eup %249 }
  0x7d   :  { %v100_v46 = vpop.permute.xlu0 %99 }
  0x7e   :  { %v115_v47 = vpop.permute.xlu1 %114  ;;  %vm106_vm1 = vcmp.eq.s32.totalorder %v100_v46, %v230_v43 }
  0x7f   :  { %v128_v48 = vmul.f32 %v115_v47, %v88_v32  ;;  %v148_v51 = vsel %vm106_vm1, 0.0, %v94_v45  ;;  %v118_v52 = vsel %vm106_vm1, %v115_v47, 0.0 }
  0x80   :  { %v149_v57 = vsel %vm62_vm0, %v148_v51, 0.0  ;;  %v119_v58 = vsel %vm62_vm0, %v118_v52, 0.0 }
  0x81   :  { %v130_v53 = vsel %vm106_vm1, %v128_v48, 0.0  ;;  %v97_v54 = vpop.permute.xlu0 %96 }
  0x82   :  { %v110_v55 = vpop.permute.xlu1 %109  ;;  %vm105_vm2 = vcmp.eq.s32.totalorder %v97_v54, %v230_v43  ;;  %v131_v61 = vsel %vm62_vm0, %v130_v53, 0.0 }
  0x83   :  { %v127_v56 = vmul.f32 %v110_v55, %v87_v33  ;;  %v147_v59 = vsel %vm105_vm2, 0.0, %v93_v50  ;;  %v117_v60 = vsel %vm105_vm2, %v110_v55, 0.0 }
  0x84   :  { %v150_v62 = vadd.f32 %v149_v57, %v147_v59  ;;  %v120_v63 = vadd.f32 %v119_v58, %v117_v60 }
  0x85   :  { %v129_v0 = vsel %vm105_vm2, %v127_v56, 0.0 }
  0x86   :  { %v132_v1 = vadd.f32 %v131_v61, %v129_v0  ;;  %v151_v2 = vrot.slane %v150_v62, 4  ;;  %v121_v3 = vrot.slane %v120_v63, 4 }
  0x88   :  { %v133_v5 = vrot.slane %v132_v1, 4  ;;  %v152_v6 = vadd.f32 %v151_v2, %v150_v62  ;;  %v122_v7 = vadd.f32 %v121_v3, %v120_v63 }
  0x8a   :  { %v134_v8 = vadd.f32 %v133_v5, %v132_v1  ;;  %v153_v9 = vrot.slane %v152_v6, 2  ;;  %v123_v10 = vrot.slane %v122_v7, 2 }
  0x8c   :  { %v135_v12 = vrot.slane %v134_v8, 2  ;;  %v154_v13 = vadd.f32 %v153_v9, %v152_v6  ;;  %v124_v15 = vadd.f32 %v123_v10, %v122_v7 }
  0x8e   :  { %v136_v16 = vadd.f32 %v135_v12, %v134_v8  ;;  %v155_v17 = vrot.slane %v154_v13, 1  ;;  %v125_v18 = vrot.slane %v124_v15, 1 }
  0x90   :  { %v137_v20 = vrot.slane %v136_v16, 1  ;;  %v126_v21 = vadd.f32 %v125_v18, %v124_v15  ;;  %v156_v23 = vadd.f32 %v155_v17, %v154_v13 }
  0x92   :  { %v138_v22 = vadd.f32 %v137_v20, %v136_v16  ;;  %v159_v24 = vmul.f32 9.2103405, %v126_v21 }
  0x94   :  { %v158_v26 = vmul.f32 %v250_v19, %v138_v22  ;;  %v160_v27 = vmul.f32 %v159_v24, %v156_v23 }
  0x96   :  { %v171_v29 = vmul.f32 %v231_v25, %v158_v26  ;;  %v175_v31 = vmul.f32 %v231_v25, %v160_v27 }
  0x98   :  { %v172_v32 = vadd.f32 %v171_v29, %v170_v28  ;;  %v176_v33 = vadd.f32 %v175_v31, %v174_v30 }
  0x9a   :  { %173 = vst [vmem:[#allocation2] sm:$0x1] %v172_v32  ;;  %177 = vst [vmem:[#allocation3] sm:$0x1] %v176_v33 }
  0xa1   :  { %v181_v34 = vld [vmem:[#allocation2] sm:$0x1]  ;;  %v193_v36 = vld [vmem:[#allocation3] sm:$0x1] }
  0xa2   :  { %v183_v35 = vsel %vm182_vm4, %v181_v34, 0.0  ;;  %v194_v37 = vsel %vm182_vm4, %v193_v36, 0.0 }
  0xa3   :  { %184 = vadd.xlane.f32.xlu0 %v183_v35  ;;  %195 = vadd.xlane.f32.xlu1 %v194_v37 }
 0x12c   :  { %v185_v38 = vpop.xlane.xlu0 %184  ;;  %v196_v14 = vpop.xlane.xlu1 %195 }
 0x12d   :  { %v186_v39 = vrot.slane %v185_v38, 4  ;;  %v197_v40 = vrot.slane %v196_v14, 4 }
 0x12f   :  { %v187_v41 = vadd.f32 %v186_v39, %v185_v38  ;;  %v198_v42 = vadd.f32 %v197_v40, %v196_v14 }
 0x131   :  { %v188_v43 = vrot.slane %v187_v41, 2  ;;  %v199_v44 = vrot.slane %v198_v42, 2 }
 0x133   :  { %v189_v45 = vadd.f32 %v188_v43, %v187_v41  ;;  %v200_v46 = vadd.f32 %v199_v44, %v198_v42 }
 0x135   :  { %v190_v47 = vrot.slane %v189_v45, 1  ;;  %v201_v48 = vrot.slane %v200_v46, 1 }
 0x137   :  { %v191_v49 = vadd.f32 %v190_v47, %v189_v45  ;;  %v202_v50 = vadd.f32 %v201_v48, %v200_v46 }
 0x139   :  { %232 = vpush %v191_v49 }
 0x13a   :  { %234 = vpush %v202_v50 }
 0x16a   :  { %s233_s1 = spop %232 }
 0x16b   :  { %s235_s28 = spop %234 }
 0x16c   :  { %s204_s29 = sadd.f32 %s235_s28, %s233_s1 }
 0x16e   :  { %v205_v51 = vstv %s204_s29 }
 0x16f   :  { %206 = vst [vmem:[#allocation4] sm:$0xff] %v205_v51 }
 0x170   :  { %262 = shalt.err (!%p259_p4)
}
 0x171   :  { %216 = dma.vmem_to_hbm [thread:$0]  %s214_s27, 128, %s338_s4, [#allocation5]  }
 0x172   :  { %271 = dma.done.wait [#allocation5], 128  }
 0x173   :  { %272 = vsyncadd [#allocation5], 4294967168 }
 0x174   :  { %220 = vsyncpa [#allocation5], 1 }

</bundles_post_ra>
